<compile_context>
chip_gen: v5e
topology: v5e:2x2
jax: 0.10.0
libtpu: 0.0.40
codegen_flags: <defaults>
</compile_context>

<pallas_src>
import math

import jax
import jax.numpy as jnp
from jax.experimental import pallas as pl
from jax.experimental.pallas import tpu as pltpu

IN_DIM = 64    # Linear(64, 128) input width
HID_DIM = 128  # Linear(64, 128) output width

# TODO(synk): `dropout_p` is undefined in the reference script; dropout is
# treated as identity (p = 0.0 / eval mode).
# NOTE: `mat3` in the reference module is never used in forward(); omitted.


def _make_sdpa_kernel(batch):
    """General-B kernel. `batch` is a static Python int baked in at trace time."""
    scale = 1.0 / math.sqrt(HID_DIM)

    def kernel(x1_ref, x2_ref, w1_ref, b1_ref, w2_ref, b2_ref, o_ref):
        x1 = x1_ref[...]                                     # (B, 64)
        x2 = x2_ref[...]                                     # (B, 64)

        v1 = jnp.dot(x1, w1_ref[...], preferred_element_type=jnp.float32) + b1_ref[...]
        v2 = jnp.dot(x2, w2_ref[...], preferred_element_type=jnp.float32) + b2_ref[...]

        # scores[i, j] = v1[i] . v2[j]: contract the last dims directly, no
        # explicit transpose materialized.
        scores = jax.lax.dot_general(
            v1, v2, dimension_numbers=(((1,), (1,)), ((), ())),
            preferred_element_type=jnp.float32) * scale      # (B, B)

        # Numerically-stable softmax over the (real, unpadded) key axis.
        m = jnp.max(scores, axis=-1, keepdims=True)
        p = jnp.exp(scores - m)
        probs = p / jnp.sum(p, axis=-1, keepdims=True)       # exact denominator

        # dropout == identity (see TODO above), then the final matmul with x1.
        if batch <= 8:
            # Tiny GEMM (M, N <= 8 rows of x1): do it as VPU broadcast
            # multiply-adds instead of a third dependent MXU pass, keeping the
            # serial MXU result FIFO (v5e/v6e MRF) off the critical path.
            out = probs[:, 0:1] * x1[0:1, :]
            for j in range(1, batch):
                out = out + probs[:, j:j + 1] * x1[j:j + 1, :]
        else:
            out = jnp.dot(probs, x1, preferred_element_type=jnp.float32)
        o_ref[...] = out.astype(o_ref.dtype)

    return kernel


def model_forward(x1, x2, w1, b1, w2, b2):
    """v7 = softmax((x1 W1 + b1)(x2 W2 + b2)^T / sqrt(128)) @ x1  (dropout = id)."""
    B = x1.shape[0]

    if B == 1:
        # Algebraic collapse for the reference's actual shape: the score matrix
        # is (1, 1), softmax of it is exactly 1.0 and dropout is identity, so
        # v7 == x1. No kernel dispatch, no padding, no HBM round trip.
        return x1

    vmem = pl.BlockSpec(memory_space=pltpu.MemorySpace.VMEM)
    return pl.pallas_call(
        _make_sdpa_kernel(B),
        out_shape=jax.ShapeDtypeStruct((B, IN_DIM), jnp.float32),
        in_specs=[vmem] * 6,
        out_specs=vmem,
    )(x1, x2, w1, b1, w2, b2)


def init_params(key):
    """Deterministic Linear(64,128) params (PyTorch-style uniform init)."""
    k1, k2, k3, k4 = jax.random.split(key, 4)
    bound = 1.0 / math.sqrt(IN_DIM)
    w1 = jax.random.uniform(k1, (IN_DIM, HID_DIM), jnp.float32, -bound, bound)
    b1 = jax.random.uniform(k2, (1, HID_DIM), jnp.float32, -bound, bound)
    w2 = jax.random.uniform(k3, (IN_DIM, HID_DIM), jnp.float32, -bound, bound)
    b2 = jax.random.uniform(k4, (1, HID_DIM), jnp.float32, -bound, bound)
    return w1, b1, w2, b2


def reference_forward(x1, x2, w1, b1, w2, b2):
    v1 = x1 @ w1 + b1
    v2 = x2 @ w2 + b2
    v3 = v1 @ v2.T
    v4 = v3 / math.sqrt(HID_DIM)
    v5 = jax.nn.softmax(v4, axis=-1)
    return v5 @ x1


if __name__ == "__main__":
    key = jax.random.PRNGKey(0)
    kx1, kx2, kp = jax.random.split(key, 3)
    w1, b1, w2, b2 = init_params(kp)

    # B=1 matches the reference module's shapes (torch.randn(1, 64)) and hits
    # the collapsed fast path; B=2 exercises the full Pallas SDPA kernel.
    for B in (1, 2):
        x1 = jax.random.normal(jax.random.fold_in(kx1, B), (B, IN_DIM), jnp.float32)
        x2 = jax.random.normal(jax.random.fold_in(kx2, B), (B, IN_DIM), jnp.float32)

        out = jax.block_until_ready(model_forward(x1, x2, w1, b1, w2, b2))
        ref = reference_forward(x1, x2, w1, b1, w2, b2)

        assert out.shape == (B, IN_DIM), out.shape
        err = float(jnp.max(jnp.abs(out - ref)))
        assert jnp.allclose(out, ref, atol=1e-4, rtol=1e-4), err

    print("KERNEL_OK")
</pallas_src>

<mosaic_0001>
module attributes {stable_mosaic.version = 11 : i64} {
  func.func @kernel(%arg0: memref<2x64xf32, #tpu.memory_space<vmem>>, %arg1: memref<2x64xf32, #tpu.memory_space<vmem>>, %arg2: memref<64x128xf32, #tpu.memory_space<vmem>>, %arg3: memref<1x128xf32, #tpu.memory_space<vmem>>, %arg4: memref<64x128xf32, #tpu.memory_space<vmem>>, %arg5: memref<1x128xf32, #tpu.memory_space<vmem>>, %arg6: memref<2x64xf32, #tpu.memory_space<vmem>>) attributes {dimension_semantics = [], scalar_prefetch = 0 : i64, scratch_operands = 0 : i64, tpu.core_type = #tpu.core_type<tc>} {
    %c0 = arith.constant 0 : index
    %c0_0 = arith.constant 0 : index
    %0 = vector.load %arg0[%c0, %c0_0] : memref<2x64xf32, #tpu.memory_space<vmem>>, vector<2x64xf32>
    %c0_1 = arith.constant 0 : index
    %c0_2 = arith.constant 0 : index
    %1 = vector.load %arg1[%c0_1, %c0_2] : memref<2x64xf32, #tpu.memory_space<vmem>>, vector<2x64xf32>
    %c0_3 = arith.constant 0 : index
    %c0_4 = arith.constant 0 : index
    %2 = vector.load %arg2[%c0_3, %c0_4] : memref<64x128xf32, #tpu.memory_space<vmem>>, vector<64x128xf32>
    %cst = arith.constant dense<0.000000e+00> : vector<2x128xf32>
    %3 = tpu.matmul %0, %2, %cst {dimension_numbers = #tpu.dot_dimension_numbers<[1], [0], [0], [1], [0, 0, 1, 1], [], []>} : vector<2x64xf32>, vector<64x128xf32>, vector<2x128xf32> -> vector<2x128xf32>
    %c0_5 = arith.constant 0 : index
    %c0_6 = arith.constant 0 : index
    %4 = vector.load %arg3[%c0_5, %c0_6] : memref<1x128xf32, #tpu.memory_space<vmem>>, vector<1x128xf32>
    %5 = vector.broadcast %4 : vector<1x128xf32> to vector<2x128xf32>
    %6 = arith.addf %3, %5 : vector<2x128xf32>
    %c0_7 = arith.constant 0 : index
    %c0_8 = arith.constant 0 : index
    %7 = vector.load %arg4[%c0_7, %c0_8] : memref<64x128xf32, #tpu.memory_space<vmem>>, vector<64x128xf32>
    %cst_9 = arith.constant dense<0.000000e+00> : vector<2x128xf32>
    %8 = tpu.matmul %1, %7, %cst_9 {dimension_numbers = #tpu.dot_dimension_numbers<[1], [0], [0], [1], [0, 0, 1, 1], [], []>} : vector<2x64xf32>, vector<64x128xf32>, vector<2x128xf32> -> vector<2x128xf32>
    %c0_10 = arith.constant 0 : index
    %c0_11 = arith.constant 0 : index
    %9 = vector.load %arg5[%c0_10, %c0_11] : memref<1x128xf32, #tpu.memory_space<vmem>>, vector<1x128xf32>
    %10 = vector.broadcast %9 : vector<1x128xf32> to vector<2x128xf32>
    %11 = arith.addf %8, %10 : vector<2x128xf32>
    %cst_12 = arith.constant dense<0.000000e+00> : vector<2x2xf32>
    %12 = tpu.matmul %6, %11, %cst_12 {dimension_numbers = #tpu.dot_dimension_numbers<[1], [1], [0], [0], [0, 0, 1, 0], [], []>} : vector<2x128xf32>, vector<2x128xf32>, vector<2x2xf32> -> vector<2x2xf32>
    %cst_13 = arith.constant 0.0883883461 : f32
    %13 = vector.broadcast %cst_13 : f32 to vector<2x2xf32>
    %14 = arith.mulf %12, %13 : vector<2x2xf32>
    %cst_14 = arith.constant dense<0xFF800000> : vector<2xf32>
    %15 = vector.multi_reduction <maximumf>, %14, %cst_14 [1] : vector<2x2xf32> to vector<2xf32>
    %16 = vector.shape_cast %15 : vector<2xf32> to vector<2x1xf32>
    %17 = vector.broadcast %16 : vector<2x1xf32> to vector<2x2xf32>
    %18 = arith.subf %14, %17 : vector<2x2xf32>
    %19 = math.exp %18 : vector<2x2xf32>
    %cst_15 = arith.constant dense<0.000000e+00> : vector<2xf32>
    %20 = vector.multi_reduction <add>, %19, %cst_15 [1] : vector<2x2xf32> to vector<2xf32>
    %21 = vector.shape_cast %20 : vector<2xf32> to vector<2x1xf32>
    %22 = vector.broadcast %21 : vector<2x1xf32> to vector<2x2xf32>
    %23 = arith.divf %19, %22 : vector<2x2xf32>
    %24 = vector.extract_strided_slice %23 {offsets = [0, 0], sizes = [2, 1], strides = [1, 1]} : vector<2x2xf32> to vector<2x1xf32>
    %25 = vector.extract_strided_slice %0 {offsets = [0, 0], sizes = [1, 64], strides = [1, 1]} : vector<2x64xf32> to vector<1x64xf32>
    %26 = vector.broadcast %24 : vector<2x1xf32> to vector<2x64xf32>
    %27 = vector.broadcast %25 : vector<1x64xf32> to vector<2x64xf32>
    %28 = arith.mulf %26, %27 : vector<2x64xf32>
    %29 = vector.extract_strided_slice %23 {offsets = [0, 1], sizes = [2, 1], strides = [1, 1]} : vector<2x2xf32> to vector<2x1xf32>
    %30 = vector.extract_strided_slice %0 {offsets = [1, 0], sizes = [1, 64], strides = [1, 1]} : vector<2x64xf32> to vector<1x64xf32>
    %31 = vector.broadcast %29 : vector<2x1xf32> to vector<2x64xf32>
    %32 = vector.broadcast %30 : vector<1x64xf32> to vector<2x64xf32>
    %33 = arith.mulf %31, %32 : vector<2x64xf32>
    %34 = arith.addf %28, %33 : vector<2x64xf32>
    %c0_16 = arith.constant 0 : index
    %c0_17 = arith.constant 0 : index
    %35 = vector.load %arg6[%c0_16, %c0_17] : memref<2x64xf32, #tpu.memory_space<vmem>>, vector<2x64xf32>
    tpu.vector_store %arg6[%c0_16, %c0_17], %34 {strides = array<i32>} : memref<2x64xf32, #tpu.memory_space<vmem>>, vector<2x64xf32>,
    return
  }
}

</mosaic_0001>

<bundles_post_ra>
// kernel: tpu_custom_call.1
= control target key start
LH: loop header
LB: loop body
LE: loop exit
PB: predicated region body
PF: predicated region fallthrough
CT: control target
= control target key end

     0   :  { %11 = vsyncpa [#allocation3], 0  ;;  %s450_s0 = inlined_call_operand.hbm [shape: f32[2,64], index: 0, kind: input, shape index: {}]   ;;  %s451_s1 = inlined_call_operand.hbm [shape: f32[2,64], index: 1, kind: input, shape index: {}]   ;;  %s452_s2 = inlined_call_operand.hbm [shape: f32[64,128], index: 2, kind: input, shape index: {}]   ;;  %s453_s3 = inlined_call_operand.vmem [shape: f32[1,128], index: 3, kind: input, shape index: {}]   ;;  %s454_s4 = inlined_call_operand.hbm [shape: f32[64,128], index: 4, kind: input, shape index: {}]   ;;  %s455_s5 = inlined_call_operand.vmem [shape: f32[1,128], index: 5, kind: input, shape index: {}]   ;;  %s456_s6 = inlined_call_operand.hbm [shape: f32[2,64], index: 6, kind: output, shape index: {}]  }
   0x1   :  { %12 = vsyncpa [#allocation6], 0 }
   0x2   :  { %13 = vsyncpa [#allocation9], 0  ;;  %s31_s23 = sshll.u32 %s451_s1, 4  ;;  %s32_s23 = int_to_ptr.hbm [resolvable:$true] %s31_s23 }
   0x3   :  { %14 = vsyncpa [#allocation4], 0  ;;  %s385_s24 = smov [#allocation5]   ;;  %s20_s28 = sshll.u32 %s450_s0, 4  ;;  %s21_s28 = int_to_ptr.hbm [resolvable:$true] %s20_s28 }
   0x4   :  { %s33_s25 = sshll.u32 %s385_s24, 4  ;;  %s386_s29 = smov [#allocation2]   ;;  %s34_s25 = int_to_ptr.vmem [resolvable:$true] %s33_s25 }
   0x5   :  { %36 = dma.hbm_to_vmem [thread:$0]  %s32_s23, 32, %s34_s25, [#allocation6]  }
   0x6   :  { %s22_s30 = sshll.u32 %s386_s29, 4  ;;  %s41_s9 = sshll.u32 %s452_s2, 4  ;;  %s23_s30 = int_to_ptr.vmem [resolvable:$true] %s22_s30  ;;  %s42_s9 = int_to_ptr.hbm [resolvable:$true] %s41_s9 }
   0x7   :  { %25 = dma.hbm_to_vmem [thread:$0]  %s21_s28, 32, %s23_s30, [#allocation3]  }
   0x8   :  { %s387_s1 = smov [#allocation7]   ;;  %s56_s13 = sshll.u32 %s454_s4, 4  ;;  %s57_s13 = int_to_ptr.hbm [resolvable:$true] %s56_s13 }
   0x9   :  { %s43_s10 = sshll.u32 %s387_s1, 4  ;;  %s388_s14 = smov 128   ;;  %s44_s10 = int_to_ptr.vmem [resolvable:$true] %s43_s10 }
   0xa   :  { %s389_s0 = smov 8   ;;  %s390_s15 = smov [#allocation8]  }
   0xb   :  { %49 = dma.hbm_to_vmem [thread:$0]  %s42_s9, 1024, %s44_s10, [#allocation6], %s388_s14, %s388_s14, %s389_s0  }
   0xc   :  { %s58_s16 = sshll.u32 %s390_s15, 4  ;;  %s59_s16 = int_to_ptr.vmem [resolvable:$true] %s58_s16 }
   0xd   :  { %64 = dma.hbm_to_vmem [thread:$0]  %s57_s13, 1024, %s59_s16, [#allocation9], %s388_s14, %s388_s14, %s389_s0  }
   0xe   :  { %377 = dma.done.wait [#allocation3], 32  }
   0xf   :  { %378 = vsyncadd [#allocation3], 4294967264 }
  0x10   :  { %379 = dma.done.wait [#allocation6], 1056  }
  0x11   :  { %380 = vsyncadd [#allocation6], 4294966240 }
  0x12   :  { %381 = dma.done.wait [#allocation9], 1024  }
  0x13   :  { %382 = vsyncadd [#allocation9], 4294966272  ;;  %v128_v0 = vld [vmem:[#allocation8 + $0x38] sm:$0xff]  ;;  %v127_v1 = vld [vmem:[#allocation8 + $0x30] sm:$0xff]  ;;  %vm97_vm0 = vcmask 523264   ;;  %vm177_vm1 = vcmask 9216  }
  0x14   :  { %v92_v2 = vld [vmem:[#allocation7 + $0x38] sm:$0xff]  ;;  %144 = vmatpush.msra.mxu1 %v128_v0  ;;  %v91_v3 = vld [vmem:[#allocation7 + $0x30] sm:$0xff]  ;;  %v126_v4 = vld [vmem:[#allocation8 + $0x28] sm:$0xff]  ;;  %v391_v32 = vmov 0   ;;  %v392_v33 = vmov 1   ;;  %s225_s21 = sshll.u32 %s456_s6, 4  ;;  %s226_s21 = int_to_ptr.hbm [resolvable:$true] %s225_s21 }
  0x15   :  { %109 = vmatpush.msra.mxu0 %v92_v2  ;;  %v90_v5 = vld [vmem:[#allocation7 + $0x28] sm:$0xff]  ;;  %v125_v6 = vld [vmem:[#allocation8 + $0x20] sm:$0xff]  ;;  %v124_v8 = vld [vmem:[#allocation8 + $0x18] sm:$0xff]  ;;  %248 = vset.pattern.permute.xlu1 %v391_v32  ;;  %vm216_vm6 = vcmask 517120  }
  0x16   :  { %145 = vmatpush.msra.mxu1 %v127_v1  ;;  %v89_v7 = vld [vmem:[#allocation7 + $0x20] sm:$0xff]  ;;  %v88_v9 = vld [vmem:[#allocation7 + $0x18] sm:$0xff]  ;;  %v123_v10 = vld [vmem:[#allocation8 + $0x10] sm:$0xff]  ;;  %250 = vset.pattern.permute.xlu0 %v392_v33 }
  0x17   :  { %110 = vmatpush.msra.mxu0 %v91_v3  ;;  %v87_v11 = vld [vmem:[#allocation7 + $0x10] sm:$0xff]  ;;  %v122_v12 = vld [vmem:[#allocation8 + $0x8] sm:$0xff]  ;;  %v121_v14 = vld [vmem:[#allocation8] sm:$0xff] }
  0x18   :  { %146 = vmatpush.msra.mxu1 %v126_v4  ;;  %v86_v13 = vld [vmem:[#allocation7 + $0x8] sm:$0xff]  ;;  %v85_v15 = vld [vmem:[#allocation7] sm:$0xff]  ;;  %v84_v16 = vld [vmem:[#allocation5] sm:$0x3] }
  0x19   :  { %111 = vmatpush.msra.mxu0 %v90_v5  ;;  %v83_v17 = vld [vmem:[#allocation2] sm:$0x3] }
  0x1a   :  { %147 = vmatpush.msra.mxu1 %v125_v6  ;;  %v252_v18 = vld [vmem:[%s455_s5] ss:$0 sm:$0xff]  ;;  %v207_v47 = vperm.slane %v83_v17, 0  ;;  %v213_v48 = vperm.slane %v83_v17, 1 }
  0x1b   :  { %112 = vmatpush.msra.mxu0 %v89_v7  ;;  %v251_v19 = vld [vmem:[%s453_s3] ss:$0 sm:$0xff]  ;;  %s393_s3 = smov [#allocation10]  }
  0x1c   :  { %148 = vmatpush.msra.mxu1 %v124_v8  ;;  %s223_s5 = sshll.u32 %s393_s3, 4  ;;  %s224_s5 = int_to_ptr.vmem [resolvable:$true] %s223_s5 }
  0x1d   :  { %113 = vmatpush.msra.mxu0 %v88_v9 }
  0x1e   :  { %149 = vmatpush.msra.mxu1 %v123_v10 }
  0x1f   :  { %114 = vmatpush.msra.mxu0 %v87_v11 }
  0x20   :  { %150 = vmatpush.msra.mxu1 %v122_v12 }
  0x21   :  { %115 = vmatpush.msra.mxu0 %v86_v13 }
  0x22   :  { %151 = vmatpush.msra.mxu1 %v121_v14 }
  0x23   :  { %116 = vmatpush.msra.mxu0 %v85_v15  ;;  %238 = vmatmul.msk.f32.vlgmr.msra.gmra.mxu1 %vm97_vm0, %v84_v16 }
  0x24   :  { %237 = vmatmul.msk.f32.vlgmr.msra.gmra.mxu0 %vm97_vm0, %v83_v17 }
  0xa0   :  { %v153_v20 = vpop.f32.mrf.mxu1 }
  0xa1   :  { %v118_v21 = vpop.f32.mrf.mxu0  ;;  %v154_v22 = vadd.f32 %v252_v18, %v153_v20 }
  0xa2   :  { %v119_v23 = vadd.f32 %v251_v19, %v118_v21 }
  0xa3   :  { %171 = vmatpush.xpose.msra.mxu2 %v154_v22 }
  0xa6   :  { %172 = vmatmul.f32.vlgmr.msra.gmra.mxu2 %v119_v23 }
 0x129   :  { %v173_v24 = vpop.f32.mrf.mxu2 }
 0x12a   :  { %v176_v25 = vmul.f32 0.088388346, %v173_v24 }
 0x12c   :  { %v178_v26 = vsel %vm177_vm1, %v176_v25, -inf }
 0x12d   :  { %179 = vmax.xlane.f32.xlu0 %v178_v26 }
 0x1a0   :  { %v180_v27 = vpop.xlane.xlu0 %179 }
 0x1a1   :  { %v181_v28 = vsub.f32 %v176_v25, %v180_v27 }
 0x1a3   :  { %v182_v29 = vmul.f32 1.442695, %v181_v28 }
 0x1a5   :  { %253 = vpow2.f32 %v182_v29 }
 0x1ab   :  { %v254_v30 = vpop.eup %253 }
 0x1ac   :  { %v184_v31 = vsel %vm177_vm1, %v254_v30, 0.0 }
 0x1ad   :  { %185 = vadd.xlane.f32.xlu0 %v184_v31 }
 0x220   :  { %v186_v34 = vpop.xlane.xlu0 %185 }
 0x221   :  { %255 = vrcp.f32 %v186_v34  ;;  %v198_v38 = vand.u32 2147483648, %v186_v34  ;;  %v196_v40 = vand.u32 2147483647, %v186_v34  ;;  %vm192_vm3 = vweird.f32 %v186_v34 }
 0x223   :  { %v199_v42 = vor.u32 1.1754944e-38, %v198_v38  ;;  %vm197_vm5 = vcmp.eq.f32.partialorder %v196_v40, 8.507059e+37 }
 0x227   :  { %v256_v35 = vpop.eup %255 }
 0x228   :  { %v188_v36 = vmul.f32 %v256_v35, %v186_v34  ;;  %vm193_vm2 = vweird.f32 %v256_v35 }
 0x229   :  { %vm194_vm4 = vmor %vm192_vm3, %vm193_vm2 }
 0x22a   :  { %v189_v37 = vsub.f32 1.0, %v188_v36 }
 0x22c   :  { %v190_v39 = vmul.f32 %v256_v35, %v189_v37 }
 0x22e   :  { %v191_v41 = vadd.f32 %v256_v35, %v190_v39 }
 0x230   :  { %v195_v43 = vsel %vm194_vm4, %v256_v35, %v191_v41 }
 0x231   :  { %v200_v44 = vsel %vm197_vm5, %v199_v42, %v195_v43 }
 0x232   :  { %v201_v45 = vmul.f32 %v254_v30, %v200_v44 }
 0x234   :  { %204 = vperm.xlu1 %248, %v201_v45  }
 0x23c   :  { %249 = vset.pattern.permute.xlu1 %v392_v33 }
 0x23d   :  { %210 = vperm.xlu1 %249, %v201_v45  }
 0x2a6   :  { %v205_v46 = vpop.permute.xlu1 %204 }
 0x2a7   :  { %v208_v50 = vmul.f32 %v207_v47, %v205_v46 }
 0x2af   :  { %v211_v49 = vpop.permute.xlu1 %210 }
 0x2b0   :  { %v214_v51 = vmul.f32 %v213_v48, %v211_v49 }
 0x2b2   :  { %v215_v52 = vadd.f32 %v214_v51, %v208_v50 }
 0x2b4   :  { %217 = vst.msk [vmem:[#allocation10] sm:$0x3] %vm216_vm6, %v215_v52 }
 0x2b5   :  { %228 = dma.vmem_to_hbm [thread:$0]  %s224_s5, 32, %s226_s21, [#allocation4]  }
 0x2b6   :  { %383 = dma.done.wait [#allocation4], 32  }
 0x2b7   :  { %384 = vsyncadd [#allocation4], 4294967264 }
 0x2b8   :  { %233 = vsyncpa [#allocation3], 1 }
 0x2b9   :  { %234 = vsyncpa [#allocation6], 1 }
 0x2ba   :  { %235 = vsyncpa [#allocation9], 1 }
 0x2bb   :  { %236 = vsyncpa [#allocation4], 1 }

</bundles_post_ra>
